<compile_context>
chip_gen: v6e
topology: v6e:2x2x1
jax: 0.10.0
libtpu: 0.0.40
codegen_flags: <defaults>
</compile_context>

<pallas_src>
import functools

import jax
import jax.numpy as jnp
from jax.experimental import pallas as pl
from jax.experimental.pallas import tpu as pltpu

# num_of_all_kinds == len([]) == 0 in the reference module, so `category`
# contributes zero feature columns and is dropped by the concat.
NUM_ALL_KINDS = 0


# ---------------------------------------------------------------------------
# Kernel 1: sequence-wide input projection (one MXU-efficient matmul).
#   xproj = X_flat @ [Wih_x | Wio_x] + [b_ih | b_io]      (T*B, H+O)
# ---------------------------------------------------------------------------
def xproj_kernel(x_ref, w_x_ref, b_in_ref, out_ref):
    out_ref[...] = (
        jnp.dot(x_ref[...], w_x_ref[...], preferred_element_type=jnp.float32)
        + b_in_ref[...]
    )


# ---------------------------------------------------------------------------
# Kernel 2: the recurrence.  grid=(T,) "arbitrary"; hidden carried in VMEM
# scratch; weights VMEM-resident (constant index_maps).  Per step:
#   ho = xproj[t] + h @ [Wih_h | Wio_h]        -> ho == [h_new | o1]
#   o2 = ho @ [Woo_h ; Woo_o] + b_oo           (cat(h_new, o1) == ho)
#   log_softmax(o2) written to out[t];  h <- h_new
# ---------------------------------------------------------------------------
def rnn_step_kernel(xproj_ref, w_h_ref, w_oo_ref, b_oo_ref, h0_ref,
                    out_ref, hid_ref, h_scr, *, hidden_size):
    t = pl.program_id(0)

    @pl.when(t == 0)
    def _():
        h_scr[...] = h0_ref[...]

    h = h_scr[...]                                    # (B, H) f32 carried state
    cd = w_h_ref.dtype                                # MXU compute dtype (bf16)

    ho = xproj_ref[0] + jnp.dot(h.astype(cd), w_h_ref[...],
                                preferred_element_type=jnp.float32)    # (B, H+O)
    h_new = ho[:, :hidden_size]                                        # (B, H)

    o2 = jnp.dot(ho.astype(cd), w_oo_ref[...],
                 preferred_element_type=jnp.float32) + b_oo_ref[...]   # (B, O)

    # dropout(p=0.1): identity in inference mode.
    # TODO(synk): training-mode dropout (stochastic mask) intentionally not applied.

    # log_softmax along dim=1 (f32, max-shift trick)
    m = jnp.max(o2, axis=1, keepdims=True)
    shifted = o2 - m
    lse = jnp.log(jnp.sum(jnp.exp(shifted), axis=1, keepdims=True))
    out_ref[0] = shifted - lse

    h_scr[...] = h_new
    hid_ref[...] = h_new


# ---------------------------------------------------------------------------
# Wrapper
# ---------------------------------------------------------------------------
def rnn_forward(category, xs, h0, params, *, compute_dtype=jnp.bfloat16):
    """Run T steps of the RNN.

    category: (B, 0) placeholder (num_of_all_kinds == 0);
    xs: (T, B, I);  h0: (B, H).
    Returns (log_probs (T, B, O), final hidden (B, H)).
    """
    del category  # zero feature columns (num_of_all_kinds == 0)
    T, B, I = xs.shape
    H = h0.shape[1]
    w_x, w_h, b_in, w_oo, b_oo = params
    HO = w_x.shape[1]
    O = HO - H

    # bf16 weights / MXU inputs; biases & accumulation stay f32.
    w_x = w_x.astype(compute_dtype)
    w_h = w_h.astype(compute_dtype)
    w_oo = w_oo.astype(compute_dtype)
    b_in = b_in.astype(jnp.float32)
    b_oo_b = jnp.broadcast_to(b_oo.astype(jnp.float32), (B, O))  # hoisted broadcast

    vmem = pl.BlockSpec(memory_space=pltpu.MemorySpace.VMEM)

    # ---- Phase 1: all x-dependent projections in one big matmul ------------
    xproj = pl.pallas_call(
        xproj_kernel,
        out_shape=jax.ShapeDtypeStruct((T * B, HO), jnp.float32),
        in_specs=[vmem, vmem, vmem],
        out_specs=vmem,
    )(xs.reshape(T * B, I).astype(compute_dtype), w_x, b_in)
    xproj = xproj.reshape(T, B, HO)

    # ---- Phase 2: sequential recurrence over the time grid -----------------
    grid_spec = pltpu.PrefetchScalarGridSpec(
        num_scalar_prefetch=0,
        grid=(T,),
        in_specs=[
            pl.BlockSpec((1, B, HO), lambda t: (t, 0, 0)),   # per-step x projection
            pl.BlockSpec((H, HO), lambda t: (0, 0)),         # [Wih_h | Wio_h] (resident)
            pl.BlockSpec((HO, O), lambda t: (0, 0)),         # [Woo_h ; Woo_o] (resident)
            pl.BlockSpec((B, O), lambda t: (0, 0)),          # b_oo, pre-broadcast
            pl.BlockSpec((B, H), lambda t: (0, 0)),          # h0
        ],
        out_specs=(
            pl.BlockSpec((1, B, O), lambda t: (t, 0, 0)),    # per-step log-probs
            pl.BlockSpec((B, H), lambda t: (0, 0)),          # final hidden (resident)
        ),
        scratch_shapes=[pltpu.VMEM((B, H), jnp.float32)],    # carried hidden state
    )

    out_shape = (jax.ShapeDtypeStruct((T, B, O), jnp.float32),
                 jax.ShapeDtypeStruct((B, H), jnp.float32))

    log_probs, hidden = pl.pallas_call(
        functools.partial(rnn_step_kernel, hidden_size=H),
        out_shape=out_shape,
        grid_spec=grid_spec,
        compiler_params=pltpu.CompilerParams(
            dimension_semantics=("arbitrary",)),             # time axis is sequential
    )(xproj, w_h, w_oo, b_oo_b, h0)
    return log_probs, hidden


# ---------------------------------------------------------------------------
# Parameters: torch-layout init + packing into the fused layout
# ---------------------------------------------------------------------------
def init_torch_params(key, input_size, hidden_size, output_size):
    """Deterministic synthetic params in the original torch (out, in) layout."""
    in_comb = NUM_ALL_KINDS + input_size + hidden_size
    ks = jax.random.split(key, 6)
    s1 = 1.0 / jnp.sqrt(in_comb)
    s2 = 1.0 / jnp.sqrt(hidden_size + output_size)
    w_i2h = jax.random.uniform(ks[0], (hidden_size, in_comb), jnp.float32, -s1, s1)
    b_i2h = jax.random.uniform(ks[1], (1, hidden_size), jnp.float32, -s1, s1)
    w_i2o = jax.random.uniform(ks[2], (output_size, in_comb), jnp.float32, -s1, s1)
    b_i2o = jax.random.uniform(ks[3], (1, output_size), jnp.float32, -s1, s1)
    w_o2o = jax.random.uniform(ks[4], (output_size, hidden_size + output_size),
                               jnp.float32, -s2, s2)
    b_o2o = jax.random.uniform(ks[5], (1, output_size), jnp.float32, -s2, s2)
    return (w_i2h, b_i2h, w_i2o, b_i2o, w_o2o, b_o2o)


def pack_params(torch_params, input_size):
    """Split-by-concat-segment, transpose to (in, out), and pack for 2-matmul form."""
    (w_i2h, b_i2h, w_i2o, b_i2o, w_o2o, b_o2o) = torch_params
    ncat = NUM_ALL_KINDS
    w_x = jnp.concatenate([w_i2h[:, ncat:ncat + input_size].T,
                           w_i2o[:, ncat:ncat + input_size].T], axis=1)   # (I, H+O)
    w_h = jnp.concatenate([w_i2h[:, ncat + input_size:].T,
                           w_i2o[:, ncat + input_size:].T], axis=1)       # (H, H+O)
    b_in = jnp.concatenate([b_i2h, b_i2o], axis=1)                        # (1, H+O)
    w_oo = w_o2o.T                                                        # (H+O, O)
    return (w_x, w_h, b_in, w_oo, b_o2o)


# ---------------------------------------------------------------------------
# Pure-JAX reference in the ORIGINAL (unfused) formulation
# ---------------------------------------------------------------------------
def rnn_forward_ref(category, xs, h0, torch_params, *, compute_dtype=jnp.bfloat16):
    (w_i2h, b_i2h, w_i2o, b_i2o, w_o2o, b_o2o) = torch_params
    cd = compute_dtype
    T = xs.shape[0]
    h = h0
    outs = []
    for t in range(T):
        inp = jnp.concatenate([category, xs[t], h], axis=1).astype(cd)
        h_new = jnp.dot(inp, w_i2h.T.astype(cd),
                        preferred_element_type=jnp.float32) + b_i2h
        o1 = jnp.dot(inp, w_i2o.T.astype(cd),
                     preferred_element_type=jnp.float32) + b_i2o
        comb = jnp.concatenate([h_new, o1], axis=1).astype(cd)
        o2 = jnp.dot(comb, w_o2o.T.astype(cd),
                     preferred_element_type=jnp.float32) + b_o2o
        outs.append(jax.nn.log_softmax(o2, axis=1))
        h = h_new
    return jnp.stack(outs, axis=0), h


if __name__ == "__main__":
    # B multiple of 8 (full sublanes); H + O = 128 (lane-dense packed projection).
    T, B, I, H, O = 16, 8, 32, 64, 64
    key = jax.random.PRNGKey(0)
    k_x, k_p = jax.random.split(key, 2)

    category = jnp.zeros((B, NUM_ALL_KINDS), jnp.float32)   # (B, 0) — matches torch module
    xs = jax.random.normal(k_x, (T, B, I), jnp.float32)
    h0 = jnp.zeros((B, H), jnp.float32)                     # initHidden()

    torch_params = init_torch_params(k_p, I, H, O)
    params = pack_params(torch_params, I)

    log_probs, hidden = rnn_forward(category, xs, h0, params)
    log_probs = jax.block_until_ready(log_probs)
    hidden = jax.block_until_ready(hidden)

    ref_lp, ref_h = rnn_forward_ref(category, xs, h0, torch_params)
    assert log_probs.shape == (T, B, O) and hidden.shape == (B, H)
    assert jnp.allclose(log_probs, ref_lp, atol=5e-3, rtol=5e-3), "log_probs mismatch"
    assert jnp.allclose(hidden, ref_h, atol=5e-3, rtol=5e-3), "hidden mismatch"

    print("KERNEL_OK")
</pallas_src>

<mosaic_0001>
module attributes {stable_mosaic.version = 11 : i64} {
  func.func @xproj_kernel(%arg0: memref<128x32xbf16, #tpu.memory_space<vmem>>, %arg1: memref<32x128xbf16, #tpu.memory_space<vmem>>, %arg2: memref<1x128xf32, #tpu.memory_space<vmem>>, %arg3: memref<128x128xf32, #tpu.memory_space<vmem>>) attributes {dimension_semantics = [], scalar_prefetch = 0 : i64, scratch_operands = 0 : i64, tpu.core_type = #tpu.core_type<tc>} {
    %c0 = arith.constant 0 : index
    %c0_0 = arith.constant 0 : index
    %0 = vector.load %arg0[%c0, %c0_0] : memref<128x32xbf16, #tpu.memory_space<vmem>>, vector<128x32xbf16>
    %c0_1 = arith.constant 0 : index
    %c0_2 = arith.constant 0 : index
    %1 = vector.load %arg1[%c0_1, %c0_2] : memref<32x128xbf16, #tpu.memory_space<vmem>>, vector<32x128xbf16>
    %cst = arith.constant dense<0.000000e+00> : vector<128x128xf32>
    %2 = tpu.matmul %0, %1, %cst {dimension_numbers = #tpu.dot_dimension_numbers<[1], [0], [0], [1], [0, 0, 1, 1], [], []>} : vector<128x32xbf16>, vector<32x128xbf16>, vector<128x128xf32> -> vector<128x128xf32>
    %c0_3 = arith.constant 0 : index
    %c0_4 = arith.constant 0 : index
    %3 = vector.load %arg2[%c0_3, %c0_4] : memref<1x128xf32, #tpu.memory_space<vmem>>, vector<1x128xf32>
    %4 = vector.broadcast %3 : vector<1x128xf32> to vector<128x128xf32>
    %5 = arith.addf %2, %4 : vector<128x128xf32>
    %c0_5 = arith.constant 0 : index
    %c0_6 = arith.constant 0 : index
    %6 = vector.load %arg3[%c0_5, %c0_6] : memref<128x128xf32, #tpu.memory_space<vmem>>, vector<128x128xf32>
    tpu.vector_store %arg3[%c0_5, %c0_6], %5 {strides = array<i32>} : memref<128x128xf32, #tpu.memory_space<vmem>>, vector<128x128xf32>,
    return
  }
}

</mosaic_0001>

<bundles_post_ra>
// kernel: tpu_custom_call.1
= control target key start
LH: loop header
LB: loop body
LE: loop exit
PB: predicated region body
PF: predicated region fallthrough
CT: control target
= control target key end

     0   :  { %vm95_vm0 = vcmask 261120   ;;  %s404_s0 = inlined_call_operand.vmem [shape: bf16[128,32], index: 0, kind: input, shape index: {}]   ;;  %s405_s1 = inlined_call_operand.vmem [shape: bf16[32,128], index: 1, kind: input, shape index: {}]   ;;  %s406_s2 = inlined_call_operand.vmem [shape: f32[1,128], index: 2, kind: input, shape index: {}]   ;;  %s407_s3 = inlined_call_operand.hbm [shape: f32[128,128], index: 3, kind: output, shape index: {}]  }
   0x1   :  { %v305_v0 = vld [vmem:[%s405_s1 + $0x8] sm:$0xff]   ;;  %v306_v1 = vld [vmem:[%s405_s1] sm:$0xff]   ;;  %v311_v6 = vld [vmem:[%s404_s0 + $0x10] sm:$0xff]  }
   0x2   :  { %278 = vmatprep.subr.bf16.mxu0 %v305_v0  ;;  %298 = vmatprep.subr.bf16.mxu1 %v305_v0  ;;  %v307_v2 = vld [vmem:[%s404_s0] sm:$0xff]   ;;  %v309_v4 = vld [vmem:[%s404_s0 + $0x8] sm:$0xff]   ;;  %v312_v7 = vld [vmem:[%s404_s0 + $0x30] sm:$0xff]  }
   0x3   :  { %279 = vmatpush3.bf16.msra.mxu0 %v305_v0  ;;  %300 = vmatpush3.bf16.msra.mxu1 %v305_v0  ;;  %v308_v3 = vld [vmem:[%s404_s0 + $0x20] sm:$0xff]   ;;  %v310_v5 = vld [vmem:[%s404_s0 + $0x28] sm:$0xff]  }
   0x4   :  { %280 = vmatprep.subr.bf16.mxu0 %v306_v1  ;;  %299 = vmatprep.subr.bf16.mxu1 %v306_v1 }
   0x5   :  { %282 = vmatprep.mubr.msk.bf16.mxu0 %vm95_vm0, %v307_v2  ;;  %290 = vmatprep.mubr.msk.bf16.mxu1 %vm95_vm0, %v308_v3 }
   0x7   :  { %281 = vmatpush3.bf16.msra.mxu0 %v306_v1  ;;  %301 = vmatpush3.bf16.msra.mxu1 %v306_v1 }
   0xa   :  { %283 = vmatmul.mubr.msk.bf16.vlgmr.msra.gmra.mxu0 %vm95_vm0, %v309_v4  ;;  %291 = vmatmul.mubr.msk.bf16.vlgmr.msra.gmra.mxu1 %vm95_vm0, %v310_v5 }
   0xb   :  { %8 = vsyncpa [#allocation3], 0  ;;  %286 = vmatprep.mubr.msk.bf16.mxu0 %vm95_vm0, %v311_v6  ;;  %294 = vmatprep.mubr.msk.bf16.mxu1 %vm95_vm0, %v312_v7  ;;  %v313_v8 = vld [vmem:[%s404_s0 + $0x18] sm:$0xff]   ;;  %v249_v10 = vld [vmem:[%s406_s2] ss:$0 sm:$0xff] }
   0xc   :  { %v314_v9 = vld [vmem:[%s404_s0 + $0x38] sm:$0xff]   ;;  %s337_s0 = smov [#allocation2]  }
   0xd   :  { %s238_s2 = sshll.u32 %s337_s0, 4  ;;  %s239_s2 = int_to_ptr.vmem [resolvable:$true] %s238_s2 }
   0xe   :  { %s315_s6 = scalar_lea.vmem %s239_s2, 2048  ;;  %p320_p1 = scmp.lt.s32.totalorder %s239_s2, %s239_s2 }
   0xf   :  { %p316_p0 = scmp.ne.s32.totalorder %s239_s2, %s315_s6  ;;  %p321_p2 = scmp.lt.s32.totalorder %s315_s6, %s315_s6 }
  0x11   :  { %p322_p3 = por %p321_p2, %p320_p1 }
  0x12   :  { %287 = vmatmul.mubr.msk.bf16.gmra.mxu0 %vm95_vm0, %v313_v8  ;;  %295 = vmatmul.mubr.msk.bf16.gmra.mxu1 %vm95_vm0, %v314_v9 }
  0x13   :  { %p323_p4 = pnand %p322_p3, %p316_p0 }
  0xca   :  { %v284_v11 = vpop.f32.mrf.mxu0  ;;  %v292_v12 = vpop.f32.mrf.mxu1 }
  0xcb   :  { %v163_v13 = vadd.f32 %v284_v11, %v249_v10  ;;  %v195_v14 = vadd.f32 %v292_v12, %v249_v10 }
  0xcc   :  { %v154_v15 = vpop.f32.mrf.mxu0  ;;  %v186_v16 = vpop.f32.mrf.mxu1 }
  0xcd   :  { %219 = vst [vmem:[#allocation2 + $0x10] sm:$0xff] %v163_v13  ;;  %227 = vst [vmem:[#allocation2 + $0x50] sm:$0xff] %v195_v14  ;;  %v155_v17 = vadd.f32 %v249_v10, %v154_v15  ;;  %v187_v18 = vadd.f32 %v249_v10, %v186_v16 }
  0xce   :  { %v285_v19 = vpop.f32.mrf.mxu0  ;;  %v293_v20 = vpop.f32.mrf.mxu1 }
  0xcf   :  { %217 = vst [vmem:[#allocation2] sm:$0xff] %v155_v17  ;;  %225 = vst [vmem:[#allocation2 + $0x40] sm:$0xff] %v187_v18  ;;  %v166_v21 = vadd.f32 %v285_v19, %v249_v10  ;;  %v198_v22 = vadd.f32 %v293_v20, %v249_v10 }
  0xd0   :  { %v157_v23 = vpop.f32.mrf.mxu0  ;;  %v189_v24 = vpop.f32.mrf.mxu1 }
  0xd1   :  { %220 = vst [vmem:[#allocation2 + $0x18] sm:$0xff] %v166_v21  ;;  %228 = vst [vmem:[#allocation2 + $0x58] sm:$0xff] %v198_v22  ;;  %v158_v25 = vadd.f32 %v249_v10, %v157_v23  ;;  %v190_v26 = vadd.f32 %v249_v10, %v189_v24 }
  0xd2   :  { %v288_v27 = vpop.f32.mrf.mxu0  ;;  %v296_v28 = vpop.f32.mrf.mxu1 }
  0xd3   :  { %218 = vst [vmem:[#allocation2 + $0x8] sm:$0xff] %v158_v25  ;;  %226 = vst [vmem:[#allocation2 + $0x48] sm:$0xff] %v190_v26  ;;  %v179_v29 = vadd.f32 %v288_v27, %v249_v10  ;;  %v211_v30 = vadd.f32 %v296_v28, %v249_v10 }
  0xd4   :  { %v170_v31 = vpop.f32.mrf.mxu0  ;;  %v202_v32 = vpop.f32.mrf.mxu1 }
  0xd5   :  { %223 = vst [vmem:[#allocation2 + $0x30] sm:$0xff] %v179_v29  ;;  %231 = vst [vmem:[#allocation2 + $0x70] sm:$0xff] %v211_v30  ;;  %v171_v33 = vadd.f32 %v249_v10, %v170_v31  ;;  %v203_v34 = vadd.f32 %v249_v10, %v202_v32 }
  0xd6   :  { %v289_v35 = vpop.f32.mrf.mxu0  ;;  %v297_v36 = vpop.f32.mrf.mxu1 }
  0xd7   :  { %221 = vst [vmem:[#allocation2 + $0x20] sm:$0xff] %v171_v33  ;;  %229 = vst [vmem:[#allocation2 + $0x60] sm:$0xff] %v203_v34  ;;  %v182_v37 = vadd.f32 %v289_v35, %v249_v10  ;;  %v214_v38 = vadd.f32 %v297_v36, %v249_v10 }
  0xd8   :  { %v173_v39 = vpop.f32.mrf.mxu0  ;;  %v205_v40 = vpop.f32.mrf.mxu1 }
  0xd9   :  { %224 = vst [vmem:[#allocation2 + $0x38] sm:$0xff] %v182_v37  ;;  %232 = vst [vmem:[#allocation2 + $0x78] sm:$0xff] %v214_v38  ;;  %v174_v41 = vadd.f32 %v249_v10, %v173_v39  ;;  %v206_v42 = vadd.f32 %v249_v10, %v205_v40 }
  0xdb   :  { %222 = vst [vmem:[#allocation2 + $0x28] sm:$0xff] %v174_v41  ;;  %230 = vst [vmem:[#allocation2 + $0x68] sm:$0xff] %v206_v42 }
  0xdc   :  { %326 = shalt.err (!%p323_p4)
}
  0xdd   :  { %s338_s7 = smov 128   ;;  %s339_s8 = smov 8  }
  0xde   :  { %244 = dma.vmem_to_hbm [thread:$0]  %s239_s2, 2048, %s407_s3, [#allocation3], %s338_s7, %s338_s7, %s339_s8  }
  0xdf   :  { %335 = dma.done.wait [#allocation3], 2048  }
  0xe0   :  { %336 = vsyncadd [#allocation3], 4294965248 }
  0xe1   :  { %248 = vsyncpa [#allocation3], 1 }

</bundles_post_ra>
